<compile_context>
chip_gen: v7x
topology: tpu7x:2x2x1
jax: 0.10.0
libtpu: 0.0.40
codegen_flags: <defaults>
</compile_context>

<pallas_src>
import functools

import jax
import jax.numpy as jnp
from jax.experimental import pallas as pl
from jax.experimental.pallas import tpu as pltpu


# ----------------------------- static module dims ---------------------------
_K1, _S1, _C1 = 6, 3, 24        # conv1: kernel, stride, out channels
_K2, _S2, _C2 = 4, 2, 48        # conv2
_HID = 256                      # fc1 hidden size
_LANE = 128
_SUB = 8


def _conv_out(size, k, s):
    return (size - k) // s + 1


def _round_up(n, m):
    return ((n + m - 1) // m) * m


# ---------------------------------------------------------------------------
# Fused Pallas kernel: conv1 GEMM -> conv2 GEMM -> fc1 -> fc2, all in VMEM.
# ---------------------------------------------------------------------------
def _dqn_kernel(p1_ref, w1_ref, b1_ref, w2_ref, b2_ref, w3_ref, b3_ref,
                w4_ref, b4_ref, o_ref, p2_ref, fcin_ref, *,
                Hq, Wq, H2, W2, BP, dot_dtype):
    f32 = jnp.float32
    P2 = H2 * W2

    # --- conv1: one GEMM over every (parity-grouped, batch-padded) patch row.
    # 1/255 input scale is folded into w1 at prep time.
    y1 = jnp.dot(p1_ref[...], w1_ref[...], preferred_element_type=f32)
    y1 = jnp.maximum(y1 + b1_ref[...], 0.0).astype(dot_dtype)
    # Rows are ordered (parity_block q, iq, jq, b).  Expose (q*Hq + iq) as the
    # leading dim and (jq*BP + b) as the sublane dim: both slice starts/lengths
    # used below are multiples of 8, so every tap gather is tile-aligned.
    y1 = y1.reshape(4 * Hq, Wq * BP, _C1)

    # --- conv2 im2col: 16 contiguous slices of y1, packed densely into the
    # (P2*BP, 16*24) patch scratch (24 lanes per tap -> K2 = 384 = 3 lane tiles)
    for di in range(_K2):
        for dj in range(_K2):
            t = di * _K2 + dj
            q = (di % 2) * 2 + (dj % 2)            # parity block
            r0 = q * Hq + di // 2                  # iq offset within block
            c0 = (dj // 2) * BP                    # jq offset (x batch pad)
            tap = y1[r0:r0 + H2, c0:c0 + W2 * BP, :]      # (H2, W2*BP, 24)
            p2_ref[:, t * _C1:(t + 1) * _C1] = tap.reshape(P2 * BP, _C1)

    # --- conv2: a single GEMM over all output positions & (padded) batch rows.
    y2 = jnp.dot(p2_ref[...], w2_ref[...], preferred_element_type=f32)
    y2 = jnp.maximum(y2 + b2_ref[...], 0.0).astype(dot_dtype)   # (P2*BP, 48)

    # --- flatten to the fc1 input: (BP, P2*48), position-major, dense channels.
    # One (BP, 48) block store per conv2 output position (no giant concat).
    for p in range(P2):
        fcin_ref[:, p * _C2:(p + 1) * _C2] = y2[p * BP:(p + 1) * BP, :]

    # --- fc1 + ReLU, fc2 (action dim zero-padded to 128 for a full-lane store)
    h = jnp.dot(fcin_ref[...], w3_ref[...], preferred_element_type=f32) + b3_ref[...]
    h = jnp.maximum(h, 0.0).astype(dot_dtype)
    o_ref[...] = jnp.dot(h, w4_ref[...], preferred_element_type=f32) + b4_ref[...]


# ---------------------------------------------------------------------------
# Wrapper-side conv1 im2col in the parity-grouped row order the kernel expects.
# ---------------------------------------------------------------------------
def _conv1_patches_parity(x, dot_dtype):
    """Rows ordered (parity_i, parity_j, iq, jq, batch padded to >=8)."""
    B, C, H, W = x.shape
    H1, W1 = _conv_out(H, _K1, _S1), _conv_out(W, _K1, _S1)
    Hq, Wq = (H1 + 1) // 2, (W1 + 1) // 2
    BP = max(_SUB, _round_up(B, _SUB))
    K1 = C * _K1 * _K1

    # (B, H1, W1, C*36) patches, feature order (c, kh, kw) like PyTorch.
    cols = []
    for i in range(_K1):
        for j in range(_K1):
            cols.append(x[:, :, i:i + _S1 * H1:_S1, j:j + _S1 * W1:_S1])
    p = jnp.stack(cols, axis=2).reshape(B, C, _K1, _K1, H1, W1)
    p = p.transpose(0, 4, 5, 1, 2, 3).reshape(B, H1, W1, K1)

    out = jnp.zeros((2, 2, Hq, Wq, BP, K1), dot_dtype)
    for pi in range(2):
        for pj in range(2):
            blk = p[:, pi::2, pj::2, :]                      # (B, hq, wq, K1)
            hq, wq = blk.shape[1], blk.shape[2]
            out = out.at[pi, pj, :hq, :wq, :B, :].set(
                blk.transpose(1, 2, 0, 3).astype(dot_dtype))
    return out.reshape(4 * Hq * Wq * BP, K1), (Hq, Wq, BP)


# ---------------------------------------------------------------------------
# Parameter prep (done ONCE): fold 1/255 into w1, permute conv2/fc1 weights to
# the kernel's dense layouts, zero-pad only the final action dim to 128 lanes.
# ---------------------------------------------------------------------------
def prepare_params(params, input_shape, num_actions, dot_dtype=jnp.float32):
    C, H, W = input_shape
    H1, W1 = _conv_out(H, _K1, _S1), _conv_out(W, _K1, _S1)
    H2, W2 = _conv_out(H1, _K2, _S2), _conv_out(W1, _K2, _S2)
    P2 = H2 * W2
    K1 = C * _K1 * _K1
    AP = _LANE
    assert num_actions <= AP, "kernel assumes num_actions <= 128"
    f32 = jnp.float32

    # conv1: (24, C, 6, 6) -> (K1, 24), feature order (c, kh, kw); 1/255 folded.
    w1 = (params["conv1_w"].reshape(_C1, K1).T / 255.0).astype(dot_dtype)
    b1 = params["conv1_b"].reshape(1, _C1).astype(f32)

    # conv2: (48, 24, 4, 4) -> (16*24, 48); row = (di*4+dj)*24 + c1, dense.
    w2 = (jnp.transpose(params["conv2_w"], (2, 3, 1, 0))
          .reshape(_K2 * _K2 * _C1, _C2).astype(dot_dtype))
    b2 = params["conv2_b"].reshape(1, _C2).astype(f32)

    # fc1: permute columns from PyTorch (c2, oi, oj) order to (position, c2).
    w3 = (params["fc1_w"].reshape(_HID, _C2, P2).transpose(2, 1, 0)
          .reshape(P2 * _C2, _HID).astype(dot_dtype))
    b3 = params["fc1_b"].reshape(1, _HID).astype(f32)

    # fc2: (A, 256) -> (256, 128) with zero-padded action columns.
    w4 = jnp.zeros((_HID, AP), dot_dtype).at[:, :num_actions].set(
        params["fc2_w"].T.astype(dot_dtype))
    b4 = jnp.zeros((1, AP), f32).at[0, :num_actions].set(params["fc2_b"])

    return {"w1": w1, "b1": b1, "w2": w2, "b2": b2,
            "w3": w3, "b3": b3, "w4": w4, "b4": b4}


# ---------------------------------------------------------------------------
# Forward: a single gridless pallas_call, all operands resident in VMEM.
# ---------------------------------------------------------------------------
def dqn_forward(x, prepped, *, num_actions):
    B, C, H, W = x.shape
    H1, W1 = _conv_out(H, _K1, _S1), _conv_out(W, _K1, _S1)
    assert H1 >= _K2 and W1 >= _K2, "input too small for conv stack"
    H2, W2 = _conv_out(H1, _K2, _S2), _conv_out(W1, _K2, _S2)
    P2 = H2 * W2
    dot_dtype = prepped["w1"].dtype
    assert prepped["w3"].shape[0] == P2 * _C2, "params prepped for another shape"

    p1, (Hq, Wq, BP) = _conv1_patches_parity(x, dot_dtype)
    AP = prepped["w4"].shape[1]

    kern = functools.partial(_dqn_kernel, Hq=Hq, Wq=Wq, H2=H2, W2=W2, BP=BP,
                             dot_dtype=dot_dtype)
    vmem = pl.BlockSpec(memory_space=pltpu.MemorySpace.VMEM)
    out = pl.pallas_call(
        kern,
        out_shape=jax.ShapeDtypeStruct((BP, AP), jnp.float32),
        in_specs=[vmem] * 9,
        out_specs=vmem,
        scratch_shapes=[
            pltpu.VMEM((P2 * BP, _K2 * _K2 * _C1), dot_dtype),   # conv2 patches
            pltpu.VMEM((BP, P2 * _C2), dot_dtype),               # fc1 input
        ],
        # Explicit VMEM budget: fits v7x's 64 MiB and lifts v5e's 16 MiB default.
        compiler_params=pltpu.CompilerParams(vmem_limit_bytes=48 * 1024 * 1024),
    )(p1, prepped["w1"], prepped["b1"], prepped["w2"], prepped["b2"],
      prepped["w3"], prepped["b3"], prepped["w4"], prepped["b4"])

    return out[:B, :num_actions]


# ---------------------------------------------------------------------------
# Raw (PyTorch-layout) parameter init and a pure-JAX reference for validation.
# ---------------------------------------------------------------------------
def init_params(key, input_shape, num_actions):
    C, H, W = input_shape
    H2 = _conv_out(_conv_out(H, _K1, _S1), _K2, _S2)
    W2 = _conv_out(_conv_out(W, _K1, _S1), _K2, _S2)
    linear_in = H2 * W2 * _C2
    ks = jax.random.split(key, 8)
    s = 0.1
    return {
        "conv1_w": jax.random.normal(ks[0], (_C1, C, _K1, _K1), jnp.float32) * s,
        "conv1_b": jax.random.normal(ks[1], (_C1,), jnp.float32) * s,
        "conv2_w": jax.random.normal(ks[2], (_C2, _C1, _K2, _K2), jnp.float32) * s,
        "conv2_b": jax.random.normal(ks[3], (_C2,), jnp.float32) * s,
        "fc1_w": jax.random.normal(ks[4], (_HID, linear_in), jnp.float32) * s,
        "fc1_b": jax.random.normal(ks[5], (_HID,), jnp.float32) * s,
        "fc2_w": jax.random.normal(ks[6], (num_actions, _HID), jnp.float32) * s,
        "fc2_b": jax.random.normal(ks[7], (num_actions,), jnp.float32) * s,
    }


def _im2col_nchw(x, kh, kw, stride):
    B, C, H, W = x.shape
    H1 = (H - kh) // stride + 1
    W1 = (W - kw) // stride + 1
    cols = []
    for i in range(kh):
        for j in range(kw):
            cols.append(x[:, :, i:i + stride * H1:stride, j:j + stride * W1:stride])
    p = jnp.stack(cols, axis=2).reshape(B, C, kh, kw, H1, W1)
    p = p.transpose(0, 4, 5, 1, 2, 3).reshape(B * H1 * W1, C * kh * kw)
    return p, H1, W1


_HI = jax.lax.Precision.HIGHEST


def _reference_forward(x, params):
    """Plain-JAX (exact f32) replica of the PyTorch forward, for validation."""
    B = x.shape[0]
    xs = x / 255.0
    p1, H1, W1 = _im2col_nchw(xs, _K1, _K1, _S1)
    y1 = jnp.maximum(jnp.dot(p1, params["conv1_w"].reshape(_C1, -1).T, precision=_HI)
                     + params["conv1_b"], 0.0)
    y1 = y1.reshape(B, H1, W1, _C1).transpose(0, 3, 1, 2)
    p2, H2, W2 = _im2col_nchw(y1, _K2, _K2, _S2)
    y2 = jnp.maximum(jnp.dot(p2, params["conv2_w"].reshape(_C2, -1).T, precision=_HI)
                     + params["conv2_b"], 0.0)
    y2 = y2.reshape(B, H2, W2, _C2).transpose(0, 3, 1, 2).reshape(B, -1)
    h = jnp.maximum(jnp.dot(y2, params["fc1_w"].T, precision=_HI) + params["fc1_b"], 0.0)
    return jnp.dot(h, params["fc2_w"].T, precision=_HI) + params["fc2_b"]


if __name__ == "__main__":
    key = jax.random.PRNGKey(0)
    k_x, k_p = jax.random.split(key)
    num_actions = 6
    batch = 2

    def _check(input_shape):
        C, H, W = input_shape
        x = jax.random.uniform(k_x, (batch, C, H, W), jnp.float32, 0.0, 255.0)
        params = init_params(k_p, input_shape, num_actions)
        q_ref = _reference_forward(x, params)

        fwd = jax.jit(functools.partial(dqn_forward, num_actions=num_actions))

        # f32 path (exact weights, tight tolerance).
        prepped = prepare_params(params, input_shape, num_actions, jnp.float32)
        q = jax.block_until_ready(fwd(x, prepped))
        assert q.shape == (batch, num_actions), q.shape
        err = float(jnp.max(jnp.abs(q - q_ref)))
        assert jnp.allclose(q, q_ref, rtol=5e-3, atol=5e-3), ("f32 mismatch", err)

        # bf16-MXU path (perf-review item for v5e/v6e/v7x), loose tolerance.
        prepped16 = prepare_params(params, input_shape, num_actions, jnp.bfloat16)
        q16 = jax.block_until_ready(fwd(x, prepped16))
        err16 = float(jnp.max(jnp.abs(q16 - q_ref)))
        assert jnp.allclose(q16, q_ref, rtol=5e-2, atol=5e-2), ("bf16 mismatch", err16)

    _check((4, 16, 16))   # H2 = W2 = 1
    _check((4, 28, 28))   # H2 = W2 = 3: exercises multi-position gather/flatten
    print("KERNEL_OK")
</pallas_src>

<mosaic_0001>
module attributes {stable_mosaic.version = 11 : i64} {
  func.func @_dqn_kernel(%arg0: memref<128x144xf32, #tpu.memory_space<vmem>>, %arg1: memref<144x24xf32, #tpu.memory_space<vmem>>, %arg2: memref<1x24xf32, #tpu.memory_space<vmem>>, %arg3: memref<384x48xf32, #tpu.memory_space<vmem>>, %arg4: memref<1x48xf32, #tpu.memory_space<vmem>>, %arg5: memref<48x256xf32, #tpu.memory_space<vmem>>, %arg6: memref<1x256xf32, #tpu.memory_space<vmem>>, %arg7: memref<256x128xf32, #tpu.memory_space<vmem>>, %arg8: memref<1x128xf32, #tpu.memory_space<vmem>>, %arg9: memref<8x128xf32, #tpu.memory_space<vmem>>, %arg10: memref<8x384xf32, #tpu.memory_space<vmem>>, %arg11: memref<8x48xf32, #tpu.memory_space<vmem>>) attributes {dimension_semantics = [], scalar_prefetch = 0 : i64, scratch_operands = 2 : i64, tpu.core_type = #tpu.core_type<tc>} {
    %c0 = arith.constant 0 : index
    %c0_0 = arith.constant 0 : index
    %0 = vector.load %arg0[%c0, %c0_0] : memref<128x144xf32, #tpu.memory_space<vmem>>, vector<128x144xf32>
    %c0_1 = arith.constant 0 : index
    %c0_2 = arith.constant 0 : index
    %1 = vector.load %arg1[%c0_1, %c0_2] : memref<144x24xf32, #tpu.memory_space<vmem>>, vector<144x24xf32>
    %cst = arith.constant dense<0.000000e+00> : vector<128x24xf32>
    %2 = tpu.matmul %0, %1, %cst {dimension_numbers = #tpu.dot_dimension_numbers<[1], [0], [0], [1], [0, 0, 1, 1], [], []>} : vector<128x144xf32>, vector<144x24xf32>, vector<128x24xf32> -> vector<128x24xf32>
    %c0_3 = arith.constant 0 : index
    %c0_4 = arith.constant 0 : index
    %3 = vector.load %arg2[%c0_3, %c0_4] : memref<1x24xf32, #tpu.memory_space<vmem>>, vector<1x24xf32>
    %4 = vector.broadcast %3 : vector<1x24xf32> to vector<128x24xf32>
    %5 = arith.addf %2, %4 : vector<128x24xf32>
    %cst_5 = arith.constant 0.000000e+00 : f32
    %6 = vector.broadcast %cst_5 : f32 to vector<128x24xf32>
    %7 = arith.maximumf %5, %6 : vector<128x24xf32>
    %8 = vector.shape_cast %7 : vector<128x24xf32> to vector<8x16x24xf32>
    %9 = vector.extract_strided_slice %8 {offsets = [0, 0, 0], sizes = [1, 8, 24], strides = [1, 1, 1]} : vector<8x16x24xf32> to vector<1x8x24xf32>
    %10 = vector.shape_cast %9 : vector<1x8x24xf32> to vector<8x24xf32>
    %c0_6 = arith.constant 0 : index
    %c0_7 = arith.constant 0 : index
    %11 = vector.load %arg10[%c0_6, %c0_7] : memref<8x384xf32, #tpu.memory_space<vmem>>, vector<8x24xf32>
    tpu.vector_store %arg10[%c0_6, %c0_7], %10 {strides = array<i32>} : memref<8x384xf32, #tpu.memory_space<vmem>>, vector<8x24xf32>,
    %12 = vector.extract_strided_slice %8 {offsets = [2, 0, 0], sizes = [1, 8, 24], strides = [1, 1, 1]} : vector<8x16x24xf32> to vector<1x8x24xf32>
    %13 = vector.shape_cast %12 : vector<1x8x24xf32> to vector<8x24xf32>
    %c0_8 = arith.constant 0 : index
    %c24 = arith.constant 24 : index
    %14 = vector.load %arg10[%c0_8, %c24] : memref<8x384xf32, #tpu.memory_space<vmem>>, vector<8x24xf32>
    tpu.vector_store %arg10[%c0_8, %c24], %13 {strides = array<i32>} : memref<8x384xf32, #tpu.memory_space<vmem>>, vector<8x24xf32>,
    %15 = vector.extract_strided_slice %8 {offsets = [0, 8, 0], sizes = [1, 8, 24], strides = [1, 1, 1]} : vector<8x16x24xf32> to vector<1x8x24xf32>
    %16 = vector.shape_cast %15 : vector<1x8x24xf32> to vector<8x24xf32>
    %c0_9 = arith.constant 0 : index
    %c48 = arith.constant 48 : index
    %17 = vector.load %arg10[%c0_9, %c48] : memref<8x384xf32, #tpu.memory_space<vmem>>, vector<8x24xf32>
    tpu.vector_store %arg10[%c0_9, %c48], %16 {strides = array<i32>} : memref<8x384xf32, #tpu.memory_space<vmem>>, vector<8x24xf32>,
    %18 = vector.extract_strided_slice %8 {offsets = [2, 8, 0], sizes = [1, 8, 24], strides = [1, 1, 1]} : vector<8x16x24xf32> to vector<1x8x24xf32>
    %19 = vector.shape_cast %18 : vector<1x8x24xf32> to vector<8x24xf32>
    %c0_10 = arith.constant 0 : index
    %c72 = arith.constant 72 : index
    %20 = vector.load %arg10[%c0_10, %c72] : memref<8x384xf32, #tpu.memory_space<vmem>>, vector<8x24xf32>
    tpu.vector_store %arg10[%c0_10, %c72], %19 {strides = array<i32>} : memref<8x384xf32, #tpu.memory_space<vmem>>, vector<8x24xf32>,
    %21 = vector.extract_strided_slice %8 {offsets = [4, 0, 0], sizes = [1, 8, 24], strides = [1, 1, 1]} : vector<8x16x24xf32> to vector<1x8x24xf32>
    %22 = vector.shape_cast %21 : vector<1x8x24xf32> to vector<8x24xf32>
    %c0_11 = arith.constant 0 : index
    %c96 = arith.constant 96 : index
    %23 = vector.load %arg10[%c0_11, %c96] : memref<8x384xf32, #tpu.memory_space<vmem>>, vector<8x24xf32>
    tpu.vector_store %arg10[%c0_11, %c96], %22 {strides = array<i32>} : memref<8x384xf32, #tpu.memory_space<vmem>>, vector<8x24xf32>,
    %24 = vector.extract_strided_slice %8 {offsets = [6, 0, 0], sizes = [1, 8, 24], strides = [1, 1, 1]} : vector<8x16x24xf32> to vector<1x8x24xf32>
    %25 = vector.shape_cast %24 : vector<1x8x24xf32> to vector<8x24xf32>
    %c0_12 = arith.constant 0 : index
    %c120 = arith.constant 120 : index
    %26 = vector.load %arg10[%c0_12, %c120] : memref<8x384xf32, #tpu.memory_space<vmem>>, vector<8x24xf32>
    tpu.vector_store %arg10[%c0_12, %c120], %25 {strides = array<i32>} : memref<8x384xf32, #tpu.memory_space<vmem>>, vector<8x24xf32>,
    %27 = vector.extract_strided_slice %8 {offsets = [4, 8, 0], sizes = [1, 8, 24], strides = [1, 1, 1]} : vector<8x16x24xf32> to vector<1x8x24xf32>
    %28 = vector.shape_cast %27 : vector<1x8x24xf32> to vector<8x24xf32>
    %c0_13 = arith.constant 0 : index
    %c144 = arith.constant 144 : index
    %29 = vector.load %arg10[%c0_13, %c144] : memref<8x384xf32, #tpu.memory_space<vmem>>, vector<8x24xf32>
    tpu.vector_store %arg10[%c0_13, %c144], %28 {strides = array<i32>} : memref<8x384xf32, #tpu.memory_space<vmem>>, vector<8x24xf32>,
    %30 = vector.extract_strided_slice %8 {offsets = [6, 8, 0], sizes = [1, 8, 24], strides = [1, 1, 1]} : vector<8x16x24xf32> to vector<1x8x24xf32>
    %31 = vector.shape_cast %30 : vector<1x8x24xf32> to vector<8x24xf32>
    %c0_14 = arith.constant 0 : index
    %c168 = arith.constant 168 : index
    %32 = vector.load %arg10[%c0_14, %c168] : memref<8x384xf32, #tpu.memory_space<vmem>>, vector<8x24xf32>
    tpu.vector_store %arg10[%c0_14, %c168], %31 {strides = array<i32>} : memref<8x384xf32, #tpu.memory_space<vmem>>, vector<8x24xf32>,
    %33 = vector.extract_strided_slice %8 {offsets = [1, 0, 0], sizes = [1, 8, 24], strides = [1, 1, 1]} : vector<8x16x24xf32> to vector<1x8x24xf32>
    %34 = vector.shape_cast %33 : vector<1x8x24xf32> to vector<8x24xf32>
    %c0_15 = arith.constant 0 : index
    %c192 = arith.constant 192 : index
    %35 = vector.load %arg10[%c0_15, %c192] : memref<8x384xf32, #tpu.memory_space<vmem>>, vector<8x24xf32>
    tpu.vector_store %arg10[%c0_15, %c192], %34 {strides = array<i32>} : memref<8x384xf32, #tpu.memory_space<vmem>>, vector<8x24xf32>,
    %36 = vector.extract_strided_slice %8 {offsets = [3, 0, 0], sizes = [1, 8, 24], strides = [1, 1, 1]} : vector<8x16x24xf32> to vector<1x8x24xf32>
    %37 = vector.shape_cast %36 : vector<1x8x24xf32> to vector<8x24xf32>
    %c0_16 = arith.constant 0 : index
    %c216 = arith.constant 216 : index
    %38 = vector.load %arg10[%c0_16, %c216] : memref<8x384xf32, #tpu.memory_space<vmem>>, vector<8x24xf32>
    tpu.vector_store %arg10[%c0_16, %c216], %37 {strides = array<i32>} : memref<8x384xf32, #tpu.memory_space<vmem>>, vector<8x24xf32>,
    %39 = vector.extract_strided_slice %8 {offsets = [1, 8, 0], sizes = [1, 8, 24], strides = [1, 1, 1]} : vector<8x16x24xf32> to vector<1x8x24xf32>
    %40 = vector.shape_cast %39 : vector<1x8x24xf32> to vector<8x24xf32>
    %c0_17 = arith.constant 0 : index
    %c240 = arith.constant 240 : index
    %41 = vector.load %arg10[%c0_17, %c240] : memref<8x384xf32, #tpu.memory_space<vmem>>, vector<8x24xf32>
    tpu.vector_store %arg10[%c0_17, %c240], %40 {strides = array<i32>} : memref<8x384xf32, #tpu.memory_space<vmem>>, vector<8x24xf32>,
    %42 = vector.extract_strided_slice %8 {offsets = [3, 8, 0], sizes = [1, 8, 24], strides = [1, 1, 1]} : vector<8x16x24xf32> to vector<1x8x24xf32>
    %43 = vector.shape_cast %42 : vector<1x8x24xf32> to vector<8x24xf32>
    %c0_18 = arith.constant 0 : index
    %c264 = arith.constant 264 : index
    %44 = vector.load %arg10[%c0_18, %c264] : memref<8x384xf32, #tpu.memory_space<vmem>>, vector<8x24xf32>
    tpu.vector_store %arg10[%c0_18, %c264], %43 {strides = array<i32>} : memref<8x384xf32, #tpu.memory_space<vmem>>, vector<8x24xf32>,
    %45 = vector.extract_strided_slice %8 {offsets = [5, 0, 0], sizes = [1, 8, 24], strides = [1, 1, 1]} : vector<8x16x24xf32> to vector<1x8x24xf32>
    %46 = vector.shape_cast %45 : vector<1x8x24xf32> to vector<8x24xf32>
    %c0_19 = arith.constant 0 : index
    %c288 = arith.constant 288 : index
    %47 = vector.load %arg10[%c0_19, %c288] : memref<8x384xf32, #tpu.memory_space<vmem>>, vector<8x24xf32>
    tpu.vector_store %arg10[%c0_19, %c288], %46 {strides = array<i32>} : memref<8x384xf32, #tpu.memory_space<vmem>>, vector<8x24xf32>,
    %48 = vector.extract_strided_slice %8 {offsets = [7, 0, 0], sizes = [1, 8, 24], strides = [1, 1, 1]} : vector<8x16x24xf32> to vector<1x8x24xf32>
    %49 = vector.shape_cast %48 : vector<1x8x24xf32> to vector<8x24xf32>
    %c0_20 = arith.constant 0 : index
    %c312 = arith.constant 312 : index
    %50 = vector.load %arg10[%c0_20, %c312] : memref<8x384xf32, #tpu.memory_space<vmem>>, vector<8x24xf32>
    tpu.vector_store %arg10[%c0_20, %c312], %49 {strides = array<i32>} : memref<8x384xf32, #tpu.memory_space<vmem>>, vector<8x24xf32>,
    %51 = vector.extract_strided_slice %8 {offsets = [5, 8, 0], sizes = [1, 8, 24], strides = [1, 1, 1]} : vector<8x16x24xf32> to vector<1x8x24xf32>
    %52 = vector.shape_cast %51 : vector<1x8x24xf32> to vector<8x24xf32>
    %c0_21 = arith.constant 0 : index
    %c336 = arith.constant 336 : index
    %53 = vector.load %arg10[%c0_21, %c336] : memref<8x384xf32, #tpu.memory_space<vmem>>, vector<8x24xf32>
    tpu.vector_store %arg10[%c0_21, %c336], %52 {strides = array<i32>} : memref<8x384xf32, #tpu.memory_space<vmem>>, vector<8x24xf32>,
    %54 = vector.extract_strided_slice %8 {offsets = [7, 8, 0], sizes = [1, 8, 24], strides = [1, 1, 1]} : vector<8x16x24xf32> to vector<1x8x24xf32>
    %55 = vector.shape_cast %54 : vector<1x8x24xf32> to vector<8x24xf32>
    %c0_22 = arith.constant 0 : index
    %c360 = arith.constant 360 : index
    %56 = vector.load %arg10[%c0_22, %c360] : memref<8x384xf32, #tpu.memory_space<vmem>>, vector<8x24xf32>
    tpu.vector_store %arg10[%c0_22, %c360], %55 {strides = array<i32>} : memref<8x384xf32, #tpu.memory_space<vmem>>, vector<8x24xf32>,
    %c0_23 = arith.constant 0 : index
    %c0_24 = arith.constant 0 : index
    %57 = vector.load %arg10[%c0_23, %c0_24] : memref<8x384xf32, #tpu.memory_space<vmem>>, vector<8x384xf32>
    %c0_25 = arith.constant 0 : index
    %c0_26 = arith.constant 0 : index
    %58 = vector.load %arg3[%c0_25, %c0_26] : memref<384x48xf32, #tpu.memory_space<vmem>>, vector<384x48xf32>
    %cst_27 = arith.constant dense<0.000000e+00> : vector<8x48xf32>
    %59 = tpu.matmul %57, %58, %cst_27 {dimension_numbers = #tpu.dot_dimension_numbers<[1], [0], [0], [1], [0, 0, 1, 1], [], []>} : vector<8x384xf32>, vector<384x48xf32>, vector<8x48xf32> -> vector<8x48xf32>
    %c0_28 = arith.constant 0 : index
    %c0_29 = arith.constant 0 : index
    %60 = vector.load %arg4[%c0_28, %c0_29] : memref<1x48xf32, #tpu.memory_space<vmem>>, vector<1x48xf32>
    %61 = vector.broadcast %60 : vector<1x48xf32> to vector<8x48xf32>
    %62 = arith.addf %59, %61 : vector<8x48xf32>
    %cst_30 = arith.constant 0.000000e+00 : f32
    %63 = vector.broadcast %cst_30 : f32 to vector<8x48xf32>
    %64 = arith.maximumf %62, %63 : vector<8x48xf32>
    %c0_31 = arith.constant 0 : index
    %c0_32 = arith.constant 0 : index
    %65 = vector.load %arg11[%c0_31, %c0_32] : memref<8x48xf32, #tpu.memory_space<vmem>>, vector<8x48xf32>
    tpu.vector_store %arg11[%c0_31, %c0_32], %64 {strides = array<i32>} : memref<8x48xf32, #tpu.memory_space<vmem>>, vector<8x48xf32>,
    %c0_33 = arith.constant 0 : index
    %c0_34 = arith.constant 0 : index
    %66 = vector.load %arg11[%c0_33, %c0_34] : memref<8x48xf32, #tpu.memory_space<vmem>>, vector<8x48xf32>
    %c0_35 = arith.constant 0 : index
    %c0_36 = arith.constant 0 : index
    %67 = vector.load %arg5[%c0_35, %c0_36] : memref<48x256xf32, #tpu.memory_space<vmem>>, vector<48x256xf32>
    %cst_37 = arith.constant dense<0.000000e+00> : vector<8x256xf32>
    %68 = tpu.matmul %66, %67, %cst_37 {dimension_numbers = #tpu.dot_dimension_numbers<[1], [0], [0], [1], [0, 0, 1, 1], [], []>} : vector<8x48xf32>, vector<48x256xf32>, vector<8x256xf32> -> vector<8x256xf32>
    %c0_38 = arith.constant 0 : index
    %c0_39 = arith.constant 0 : index
    %69 = vector.load %arg6[%c0_38, %c0_39] : memref<1x256xf32, #tpu.memory_space<vmem>>, vector<1x256xf32>
    %70 = vector.broadcast %69 : vector<1x256xf32> to vector<8x256xf32>
    %71 = arith.addf %68, %70 : vector<8x256xf32>
    %cst_40 = arith.constant 0.000000e+00 : f32
    %72 = vector.broadcast %cst_40 : f32 to vector<8x256xf32>
    %73 = arith.maximumf %71, %72 : vector<8x256xf32>
    %c0_41 = arith.constant 0 : index
    %c0_42 = arith.constant 0 : index
    %74 = vector.load %arg7[%c0_41, %c0_42] : memref<256x128xf32, #tpu.memory_space<vmem>>, vector<256x128xf32>
    %cst_43 = arith.constant dense<0.000000e+00> : vector<8x128xf32>
    %75 = tpu.matmul %73, %74, %cst_43 {dimension_numbers = #tpu.dot_dimension_numbers<[1], [0], [0], [1], [0, 0, 1, 1], [], []>} : vector<8x256xf32>, vector<256x128xf32>, vector<8x128xf32> -> vector<8x128xf32>
    %c0_44 = arith.constant 0 : index
    %c0_45 = arith.constant 0 : index
    %76 = vector.load %arg8[%c0_44, %c0_45] : memref<1x128xf32, #tpu.memory_space<vmem>>, vector<1x128xf32>
    %77 = vector.broadcast %76 : vector<1x128xf32> to vector<8x128xf32>
    %78 = arith.addf %75, %77 : vector<8x128xf32>
    %c0_46 = arith.constant 0 : index
    %c0_47 = arith.constant 0 : index
    %79 = vector.load %arg9[%c0_46, %c0_47] : memref<8x128xf32, #tpu.memory_space<vmem>>, vector<8x128xf32>
    tpu.vector_store %arg9[%c0_46, %c0_47], %78 {strides = array<i32>} : memref<8x128xf32, #tpu.memory_space<vmem>>, vector<8x128xf32>,
    return
  }
}

</mosaic_0001>

<bundles_post_ra>
// kernel: dqn_forward.1
= control target key start
LH: loop header
LB: loop body
LE: loop exit
PB: predicated region body
PF: predicated region fallthrough
CT: control target
= control target key end

     0   :  { %v1097_v0 = vmov 0.0|0.0   ;;  %vm89_vm0 = vcmask 130048   ;;  %vm299_vm1 = vcmask 195584   ;;  %s1101_s29 = smov 88   ;;  %s1102_s20 = smov 16   ;;  %vm305_vm2 = vcmask 392384   ;;  %s1667_s1 = inlined_call_operand.vmem [shape: f32[144,24], index: 1, kind: input, shape index: {}]   ;;  %s1668_s0 = inlined_call_operand.vmem [shape: f32[128,144], index: 0, kind: input, shape index: {}]   ;;  %s1669_s2 = inlined_call_operand.vmem [shape: f32[1,24], index: 2, kind: input, shape index: {}]   ;;  %s1670_s3 = inlined_call_operand.vmem [shape: f32[384,48], index: 3, kind: input, shape index: {}]   ;;  %s1671_s5 = inlined_call_operand.vmem [shape: f32[48,256], index: 5, kind: input, shape index: {}]   ;;  %s1672_s7 = inlined_call_operand.vmem [shape: f32[256,128], index: 7, kind: input, shape index: {}]   ;;  %s1673_s4 = inlined_call_operand.vmem [shape: f32[1,48], index: 4, kind: input, shape index: {}]   ;;  %s1674_s6 = inlined_call_operand.vmem [shape: f32[1,256], index: 6, kind: input, shape index: {}]   ;;  %s1675_s8 = inlined_call_operand.vmem [shape: f32[1,128], index: 8, kind: input, shape index: {}]   ;;  %s1676_s9 = inlined_call_operand.vmem [shape: f32[8,128], index: 9, kind: output, shape index: {}]  }
   0x1   :  { %952 = vmatprep.subr.bf16.mxu0 %v1097_v0  ;;  %v64_v1 = vld [vmem:[%s1667_s1] sm:$0xff]  ;;  %v65_v2 = vld [vmem:[%s1667_s1 + $0x8] sm:$0xff]  ;;  %v66_v3 = vld [vmem:[%s1667_s1 + $0x10] sm:$0xff]  ;;  %s1103_s21 = smov 120   ;;  %s1104_s22 = smov 40   ;;  %vm311_vm3 = vcmask 589184  }
   0x2   :  { %v953_v4 = vpack.c.bf16 %v65_v2, %v64_v1  ;;  %v67_v5 = vld [vmem:[%s1667_s1 + $0x18] sm:$0xff]  ;;  %v68_v7 = vld [vmem:[%s1667_s1 + $0x20] sm:$0xff]  ;;  %v69_v8 = vld [vmem:[%s1667_s1 + $0x28] sm:$0xff]  ;;  %s1105_s23 = smov 72   ;;  %s1108_s24 = smov 32   ;;  %vm336_vm4 = vcmask 326784  }
   0x3   :  { %v956_v6 = vpack.c.bf16 %v67_v5, %v66_v3  ;;  %v33_v9 = vld [vmem:[%s1668_s0 + $0x8] sm:$0xff]  ;;  %v959_v10 = vpack.c.bf16 %v69_v8, %v68_v7  ;;  %v70_v11 = vld [vmem:[%s1667_s1 + $0x30] sm:$0xff]  ;;  %v71_v12 = vld [vmem:[%s1667_s1 + $0x38] sm:$0xff]  ;;  %s1109_s25 = smov 8   ;;  %s1110_s26 = smov 80   ;;  %vm342_vm5 = vcmask 523584  }
   0x4   :  { %954 = vmatpush1.bf16.msra.mxu0 %v953_v4  ;;  %811 = vmatprep.mubr.msk.f32.mxu0 %vm89_vm0, %v33_v9  ;;  %v962_v13 = vpack.c.bf16 %v71_v12, %v70_v11  ;;  %v72_v14 = vld [vmem:[%s1667_s1 + $0x40] sm:$0xff]  ;;  %v73_v15 = vld [vmem:[%s1667_s1 + $0x48] sm:$0xff]  ;;  %v74_v17 = vld [vmem:[%s1667_s1 + $0x50] sm:$0xff]  ;;  %s1111_s27 = smov 56   ;;  %s1112_s28 = smov 104   ;;  %vm317_vm6 = vcmask 785984  }
   0x5   :  { %955 = vmatprep.subr.bf16.mxu0 %v1097_v0  ;;  %v965_v16 = vpack.c.bf16 %v73_v15, %v72_v14  ;;  %v75_v18 = vld [vmem:[%s1667_s1 + $0x58] sm:$0xff]  ;;  %v76_v20 = vld [vmem:[%s1667_s1 + $0x60] sm:$0xff]  ;;  %v77_v21 = vld [vmem:[%s1667_s1 + $0x68] sm:$0xff]  ;;  %vm348_vm7 = vcmask 720384   ;;  %vm354_vm8 = vcmask 917184   ;;  %vm360_vm9 = vcmask 1048448  }
   0x6   :  { %v968_v19 = vpack.c.bf16 %v75_v18, %v74_v17  ;;  %v971_v22 = vpack.c.bf16 %v77_v21, %v76_v20  ;;  %v78_v23 = vld [vmem:[%s1667_s1 + $0x70] sm:$0xff]  ;;  %v79_v24 = vld [vmem:[%s1667_s1 + $0x78] sm:$0xff]  ;;  %v80_v26 = vld [vmem:[%s1667_s1 + $0x80] sm:$0xff]  ;;  %vm362_vm10 = vcmask 64512   ;;  %vm323_vm11 = vcmask 982784  }
   0x7   :  { %v974_v25 = vpack.c.bf16 %v79_v24, %v78_v23  ;;  %v81_v27 = vld [vmem:[%s1667_s1 + $0x88] sm:$0xff]  ;;  %v32_v29 = vld [vmem:[%s1668_s0] sm:$0xff]  ;;  %v35_v30 = vld [vmem:[%s1668_s0 + $0x18] sm:$0xff]  ;;  %s1100_s1 = smov 24   ;;  %vm329_vm12 = vcmask 1048512   ;;  %vm368_vm13 = vcmask 261184  }
   0x8   :  { %957 = vmatpush1.bf16.msra.mxu0 %v956_v6  ;;  %v977_v28 = vpack.c.bf16 %v81_v27, %v80_v26  ;;  %v34_v31 = vld [vmem:[%s1668_s0 + $0x10] sm:$0xff]  ;;  %v37_v32 = vld [vmem:[%s1668_s0 + $0x28] sm:$0xff]  ;;  %v36_v33 = vld [vmem:[%s1668_s0 + $0x20] sm:$0xff]  ;;  %vm374_vm14 = vcmask 457984   ;;  %vm380_vm15 = vcmask 654784  }
   0x9   :  { %958 = vmatprep.subr.bf16.mxu0 %v1097_v0  ;;  %v39_v34 = vld [vmem:[%s1668_s0 + $0x38] sm:$0xff]  ;;  %v38_v35 = vld [vmem:[%s1668_s0 + $0x30] sm:$0xff]  ;;  %v41_v36 = vld [vmem:[%s1668_s0 + $0x48] sm:$0xff] }
   0xa   :  { %v40_v37 = vld [vmem:[%s1668_s0 + $0x40] sm:$0xff]  ;;  %v43_v38 = vld [vmem:[%s1668_s0 + $0x58] sm:$0xff]  ;;  %v42_v39 = vld [vmem:[%s1668_s0 + $0x50] sm:$0xff] }
   0xb   :  { %v45_v40 = vld [vmem:[%s1668_s0 + $0x68] sm:$0xff]  ;;  %v44_v41 = vld [vmem:[%s1668_s0 + $0x60] sm:$0xff]  ;;  %v47_v42 = vld [vmem:[%s1668_s0 + $0x78] sm:$0xff] }
   0xc   :  { %960 = vmatpush1.bf16.msra.mxu0 %v959_v10  ;;  %v46_v43 = vld [vmem:[%s1668_s0 + $0x70] sm:$0xff]  ;;  %v49_v44 = vld [vmem:[%s1668_s0 + $0x88] sm:$0xff]  ;;  %v48_v45 = vld [vmem:[%s1668_s0 + $0x80] sm:$0xff] }
   0xd   :  { %961 = vmatprep.subr.bf16.mxu0 %v1097_v0  ;;  %v51_v46 = vld [vmem:[%s1668_s0 + $0x98] sm:$0xff]  ;;  %v50_v47 = vld [vmem:[%s1668_s0 + $0x90] sm:$0xff]  ;;  %v53_v48 = vld [vmem:[%s1668_s0 + $0xa8] sm:$0xff] }
   0xe   :  { %v52_v49 = vld [vmem:[%s1668_s0 + $0xa0] sm:$0xff]  ;;  %v55_v50 = vld [vmem:[%s1668_s0 + $0xb8] sm:$0xff]  ;;  %v54_v51 = vld [vmem:[%s1668_s0 + $0xb0] sm:$0xff] }
   0xf   :  { %v57_v52 = vld [vmem:[%s1668_s0 + $0xc8] sm:$0xff]  ;;  %v56_v53 = vld [vmem:[%s1668_s0 + $0xc0] sm:$0xff]  ;;  %v59_v54 = vld [vmem:[%s1668_s0 + $0xd8] sm:$0xff] }
  0x10   :  { %963 = vmatpush1.bf16.msra.mxu0 %v962_v13  ;;  %v58_v55 = vld [vmem:[%s1668_s0 + $0xd0] sm:$0xff]  ;;  %v61_v56 = vld [vmem:[%s1668_s0 + $0xe8] sm:$0xff]  ;;  %v60_v57 = vld [vmem:[%s1668_s0 + $0xe0] sm:$0xff] }
  0x11   :  { %964 = vmatprep.subr.bf16.mxu0 %v1097_v0  ;;  %v63_v58 = vld [vmem:[%s1668_s0 + $0xf8] sm:$0xff]  ;;  %v62_v59 = vld [vmem:[%s1668_s0 + $0xf0] sm:$0xff]  ;;  %v1343_v60 = vld [vmem:[%s1669_s2] ss:$0 sm:$0xff]  ;;  %s1098_s0 = smov 48   ;;  %s1099_s2 = smov 64  }
  0x12   :  { %v413_v13 = vld [vmem:[%s1670_s3 + $0x80] sm:$0xff]  ;;  %v414_v14 = vld [vmem:[%s1670_s3 + $0x88] sm:$0xff]  ;;  %v415_v27 = vld [vmem:[%s1670_s3 + $0x90] sm:$0xff] }
  0x13   :  { %v397_v15 = vld [vmem:[%s1670_s3] sm:$0xff]  ;;  %v979_v18 = vpack.c.bf16 %v414_v14, %v413_v13  ;;  %v410_v14 = vld [vmem:[%s1670_s3 + $0x68] sm:$0xff] }
  0x14   :  { %966 = vmatpush1.bf16.msra.mxu0 %v965_v16  ;;  %v409_v13 = vld [vmem:[%s1670_s3 + $0x60] sm:$0xff] }
  0x15   :  { %967 = vmatprep.subr.bf16.mxu0 %v1097_v0  ;;  %980 = vmatprep.subr.bf16.mxu1 %v979_v18 }
  0x18   :  { %969 = vmatpush1.bf16.msra.mxu0 %v968_v19  ;;  %v398_v19 = vld [vmem:[%s1670_s3 + $0x8] sm:$0xff] }
  0x19   :  { %970 = vmatprep.subr.bf16.mxu0 %v1097_v0  ;;  %v981_v20 = vpack.c.bf16 %v398_v19, %v397_v15  ;;  %v1005_v15 = vpack.c.bf16 %v410_v14, %v409_v13  ;;  %v427_v19 = vld [vmem:[%s1670_s3 + $0xf0] sm:$0xff]  ;;  %v436_v14 = vld [vmem:[%s1670_s3 + $0x138] sm:$0xff] }
  0x1a   :  { %v435_v13 = vld [vmem:[%s1670_s3 + $0x130] sm:$0xff] }
  0x1b   :  { %982 = vmatpush3.bf16.msra.mxu1 %v981_v20  ;;  %v428_v20 = vld [vmem:[%s1670_s3 + $0xf8] sm:$0xff] }
  0x1c   :  { %972 = vmatpush1.bf16.msra.mxu0 %v971_v22 }
  0x1d   :  { %973 = vmatprep.subr.bf16.mxu0 %v1097_v0 }
  0x20   :  { %975 = vmatpush1.bf16.msra.mxu0 %v974_v25 }
  0x21   :  { %976 = vmatprep.subr.bf16.mxu0 %v1097_v0 }
  0x24   :  { %978 = vmatpush1.bf16.msra.mxu0 %v977_v28  ;;  %v416_v28 = vld [vmem:[%s1670_s3 + $0x98] sm:$0xff] }
  0x27   :  { %203 = vmatmul.mubr.f32.vlgmr.msra.gmra.mrb[0].mxu0 %v32_v29  ;;  %v983_v29 = vpack.c.bf16 %v416_v28, %v415_v27 }
  0x28   :  { %812 = vmatprep.mubr.msk.f32.mxu0 %vm89_vm0, %v35_v30  ;;  %v399_v30 = vld [vmem:[%s1670_s3 + $0x10] sm:$0xff] }
  0x29   :  { %984 = vmatprep.subr.bf16.mxu1 %v983_v29 }
  0x2b   :  { %208 = vmatmul.mubr.f32.gmra.mrb[2].mxu0 %v34_v31  ;;  %v400_v31 = vld [vmem:[%s1670_s3 + $0x18] sm:$0xff] }
  0x2c   :  { %813 = vmatprep.mubr.msk.f32.mxu0 %vm89_vm0, %v37_v32 }
  0x2f   :  { %213 = vmatmul.mubr.f32.gmra.mrb[4].mxu0 %v36_v33  ;;  %v985_v33 = vpack.c.bf16 %v400_v31, %v399_v30 }
  0x30   :  { %814 = vmatprep.mubr.msk.f32.mxu0 %vm89_vm0, %v39_v34  ;;  %v417_v34 = vld [vmem:[%s1670_s3 + $0xa0] sm:$0xff] }
  0x31   :  { %986 = vmatpush3.bf16.msra.mxu1 %v985_v33 }
  0x33   :  { %218 = vmatmul.mubr.f32.gmra.mrb[6].mxu0 %v38_v35  ;;  %v418_v35 = vld [vmem:[%s1670_s3 + $0xa8] sm:$0xff] }
  0x34   :  { %815 = vmatprep.mubr.msk.f32.mxu0 %vm89_vm0, %v41_v36  ;;  %v401_v36 = vld [vmem:[%s1670_s3 + $0x20] sm:$0xff] }
  0x37   :  { %223 = vmatmul.mubr.f32.gmra.mrb[8].mxu0 %v40_v37 }
  0x38   :  { %816 = vmatprep.mubr.msk.f32.mxu0 %vm89_vm0, %v43_v38  ;;  %v987_v38 = vpack.c.bf16 %v418_v35, %v417_v34 }
  0x3a   :  { %988 = vmatprep.subr.bf16.mxu1 %v987_v38 }
  0x3b   :  { %228 = vmatmul.mubr.f32.gmra.mrb[10].mxu0 %v42_v39  ;;  %v402_v39 = vld [vmem:[%s1670_s3 + $0x28] sm:$0xff] }
  0x3c   :  { %817 = vmatprep.mubr.msk.f32.mxu0 %vm89_vm0, %v45_v40  ;;  %v419_v40 = vld [vmem:[%s1670_s3 + $0xb0] sm:$0xff] }
  0x3f   :  { %233 = vmatmul.mubr.f32.gmra.mrb[12].mxu0 %v44_v41  ;;  %v420_v41 = vld [vmem:[%s1670_s3 + $0xb8] sm:$0xff] }
  0x40   :  { %818 = vmatprep.mubr.msk.f32.mxu0 %vm89_vm0, %v47_v42 }
  0x43   :  { %238 = vmatmul.mubr.f32.gmra.mrb[14].mxu0 %v46_v43  ;;  %v989_v43 = vpack.c.bf16 %v402_v39, %v401_v36 }
  0x44   :  { %819 = vmatprep.mubr.msk.f32.mxu0 %vm89_vm0, %v49_v44  ;;  %v991_v44 = vpack.c.bf16 %v420_v41, %v419_v40 }
  0x45   :  { %990 = vmatpush3.bf16.msra.mxu1 %v989_v43 }
  0x46   :  { %992 = vmatprep.subr.bf16.mxu1 %v991_v44 }
  0x47   :  { %243 = vmatmul.mubr.f32.gmra.mrb[16].mxu0 %v48_v45  ;;  %v403_v45 = vld [vmem:[%s1670_s3 + $0x30] sm:$0xff] }
  0x48   :  { %820 = vmatprep.mubr.msk.f32.mxu0 %vm89_vm0, %v51_v46  ;;  %v404_v46 = vld [vmem:[%s1670_s3 + $0x38] sm:$0xff] }
  0x4b   :  { %248 = vmatmul.mubr.f32.gmra.mrb[18].mxu0 %v50_v47 }
  0x4c   :  { %821 = vmatprep.mubr.msk.f32.mxu0 %vm89_vm0, %v53_v48 }
  0x4f   :  { %253 = vmatmul.mubr.f32.gmra.mrb[20].mxu0 %v52_v49  ;;  %v993_v49 = vpack.c.bf16 %v404_v46, %v403_v45 }
  0x50   :  { %822 = vmatprep.mubr.msk.f32.mxu0 %vm89_vm0, %v55_v50 }
  0x51   :  { %994 = vmatpush3.bf16.msra.mxu1 %v993_v49 }
  0x53   :  { %258 = vmatmul.mubr.f32.gmra.mrb[22].mxu0 %v54_v51 }
  0x54   :  { %823 = vmatprep.mubr.msk.f32.mxu0 %vm89_vm0, %v57_v52 }
  0x57   :  { %263 = vmatmul.mubr.f32.gmra.mrb[24].mxu0 %v56_v53  ;;  %v421_v53 = vld [vmem:[%s1670_s3 + $0xc0] sm:$0xff] }
  0x58   :  { %824 = vmatprep.mubr.msk.f32.mxu0 %vm89_vm0, %v59_v54  ;;  %v422_v54 = vld [vmem:[%s1670_s3 + $0xc8] sm:$0xff] }
  0x5b   :  { %268 = vmatmul.mubr.f32.gmra.mrb[26].mxu0 %v58_v55  ;;  %v995_v55 = vpack.c.bf16 %v422_v54, %v421_v53 }
  0x5c   :  { %825 = vmatprep.mubr.msk.f32.mxu0 %vm89_vm0, %v61_v56  ;;  %v405_v56 = vld [vmem:[%s1670_s3 + $0x40] sm:$0xff] }
  0x5d   :  { %996 = vmatprep.subr.bf16.mxu1 %v995_v55 }
  0x5f   :  { %273 = vmatmul.mubr.f32.gmra.mrb[28].mxu0 %v60_v57  ;;  %v406_v57 = vld [vmem:[%s1670_s3 + $0x48] sm:$0xff] }
  0x60   :  { %826 = vmatprep.mubr.msk.f32.mxu0 %vm89_vm0, %v63_v58 }
  0x63   :  { %278 = vmatmul.mubr.f32.gmra.mrb[30].mxu0 %v62_v59  ;;  %v997_v59 = vpack.c.bf16 %v406_v57, %v405_v56 }
  0x65   :  { %998 = vmatpush3.bf16.msra.mxu1 %v997_v59  ;;  %v429_v59 = vld [vmem:[%s1670_s3 + $0x100] sm:$0xff] }
  0xfa   :  { %v204_v61 = vpop.f32.mrb[0].mxu0 }
  0xfb   :  { %v205_v62 = vadd.f32 %v1343_v60, %v204_v61  ;;  %v206_v63 = vpop.f32.mrb[1].mxu0 }
  0xfc   :  { %v423_v63 = vld [vmem:[%s1670_s3 + $0xd0] sm:$0xff] }
  0xfd   :  { %v283_v1 = vmax.f32 %v205_v62, 0.0 }
  0xfe   :  { %v209_v2 = vpop.f32.mrb[2].mxu0 }
  0xff   :  { %300 = vst.msk [vmem:[#allocation2] sm:$0xff] %vm299_vm1, %v283_v1  ;;  %v210_v3 = vadd.f32 %v1343_v60, %v209_v2  ;;  %v211_v4 = vpop.f32.mrb[3].mxu0  ;;  %v424_v1 = vld [vmem:[%s1670_s3 + $0xd8] sm:$0xff]  ;;  %vm392_vm1 = vcmask 1048384  }
 0x100   :  { %v999_v2 = vpack.c.bf16 %v424_v1, %v423_v63  ;;  %v408_v4 = vld [vmem:[%s1670_s3 + $0x58] sm:$0xff] }
 0x101   :  { %v284_v5 = vmax.f32 %v210_v3, 0.0  ;;  %v407_v3 = vld [vmem:[%s1670_s3 + $0x50] sm:$0xff] }
 0x102   :  { %v214_v6 = vpop.f32.mrb[4].mxu0  ;;  %1000 = vmatprep.subr.bf16.mxu1 %v999_v2 }
 0x103   :  { %v215_v7 = vadd.f32 %v1343_v60, %v214_v6  ;;  %v216_v8 = vpop.f32.mrb[5].mxu0  ;;  %308 = vrot.lane.b32.xlu0 %v284_v5, %s1098_s0  ;;  %v1001_v5 = vpack.c.bf16 %v408_v4, %v407_v3  ;;  %s1106_s0 = smov 112   ;;  %v431_v3 = vld [vmem:[%s1670_s3 + $0x110] sm:$0xff]  ;;  %v432_v4 = vld [vmem:[%s1670_s3 + $0x118] sm:$0xff] }
 0x105   :  { %v285_v9 = vmax.f32 %v215_v7, 0.0  ;;  %1002 = vmatpush3.bf16.msra.mxu1 %v1001_v5 }
 0x106   :  { %v1348_v10 = vpop.f32.mrb[6].mxu0 }
 0x107   :  { %v221_v11 = vpop.f32.mrb[7].mxu0  ;;  %345 = vrot.lane.b32.xlu1 %v285_v9, %s1099_s2  ;;  %v425_v9 = vld [vmem:[%s1670_s3 + $0xe0] sm:$0xff]  ;;  %v220_v31 = vadd.f32 %v1343_v60, %v1348_v10  ;;  %s1107_s2 = smov 96  }
 0x108   :  { %v426_v11 = vld [vmem:[%s1670_s3 + $0xe8] sm:$0xff] }
 0x109   :  { %v286_v38 = vmax.f32 %v220_v31, 0.0  ;;  %v599_v31 = vld [vmem:[%s1671_s5 + $0x18] sm:$0xff] }
 0x10a   :  { %v224_v12 = vpop.f32.mrb[8].mxu0 }
 0x10b   :  { %v225_v16 = vadd.f32 %v1343_v60, %v224_v12  ;;  %v226_v17 = vpop.f32.mrb[9].mxu0  ;;  %v1003_v12 = vpack.c.bf16 %v426_v11, %v425_v9  ;;  %v434_v9 = vld [vmem:[%s1670_s3 + $0x128] sm:$0xff] }
 0x10d   :  { %v287_v21 = vmax.f32 %v225_v16, 0.0  ;;  %1004 = vmatprep.subr.bf16.mxu1 %v1003_v12 }
 0x10e   :  { %v1363_v22 = vpop.f32.mrb[10].mxu0  ;;  %1006 = vmatpush3.bf16.msra.mxu1 %v1005_v15  ;;  %v1021_v15 = vpack.c.bf16 %v436_v14, %v435_v13  ;;  %v723_v13 = vld [vmem:[%s1672_s7 + $0xd8] sm:$0xff] }
 0x10f   :  { %v231_v23 = vpop.f32.mrb[11].mxu0  ;;  %302 = vrot.lane.b32.xlu1 %v287_v21, %s1100_s1  ;;  %v1007_v21 = vpack.c.bf16 %v428_v20, %v427_v19  ;;  %v439_v19 = vld [vmem:[%s1670_s3 + $0x150] sm:$0xff]  ;;  %v440_v20 = vld [vmem:[%s1670_s3 + $0x158] sm:$0xff] }
 0x110   :  { %v411_v23 = vld [vmem:[%s1670_s3 + $0x70] sm:$0xff] }
 0x111   :  { %1008 = vmatprep.subr.bf16.mxu1 %v1007_v21  ;;  %v1027_v21 = vpack.c.bf16 %v440_v20, %v439_v19  ;;  %v725_v19 = vld [vmem:[%s1672_s7 + $0xe8] sm:$0xff] }
 0x112   :  { %v234_v24 = vpop.f32.mrb[12].mxu0 }
 0x113   :  { %v235_v25 = vadd.f32 %v1343_v60, %v234_v24  ;;  %v236_v26 = vpop.f32.mrb[13].mxu0  ;;  %v412_v24 = vld [vmem:[%s1670_s3 + $0x78] sm:$0xff] }
 0x114   :  { %v1009_v27 = vpack.c.bf16 %v412_v24, %v411_v23  ;;  %v441_v23 = vld [vmem:[%s1670_s3 + $0x160] sm:$0xff]  ;;  %v442_v24 = vld [vmem:[%s1670_s3 + $0x168] sm:$0xff] }
 0x115   :  { %v289_v32 = vmax.f32 %v235_v25, 0.0  ;;  %v230_v25 = vadd.f32 %v1343_v60, %v1363_v22 }
 0x116   :  { %v1387_v37 = vpop.f32.mrb[14].mxu0  ;;  %1010 = vmatpush3.bf16.msra.mxu1 %v1009_v27  ;;  %v444_v27 = vld [vmem:[%s1670_s3 + $0x178] sm:$0xff] }
 0x117   :  { %v241_v42 = vpop.f32.mrb[15].mxu0  ;;  %351 = vrot.lane.b32.xlu1 %v289_v32, %s1101_s29  ;;  %1011 = vmatprep.subr.bf16.mxu1 %v1097_v0  ;;  %v288_v32 = vmax.f32 %v230_v25, 0.0  ;;  %v240_v39 = vadd.f32 %v1343_v60, %v1387_v37  ;;  %v1030_v25 = vpack.c.bf16 %v442_v24, %v441_v23  ;;  %v708_v23 = vld [vmem:[%s1672_s7 + $0x60] sm:$0xff]  ;;  %v709_v24 = vld [vmem:[%s1672_s7 + $0x68] sm:$0xff] }
 0x119   :  { %v290_v44 = vmax.f32 %v240_v39, 0.0  ;;  %v602_v39 = vld [vmem:[%s1671_s5 + $0x30] sm:$0xff] }
 0x11a   :  { %v244_v47 = vpop.f32.mrb[16].mxu0 }
 0x11b   :  { %v246_v48 = vpop.f32.mrb[17].mxu0  ;;  %v245_v33 = vadd.f32 %v1343_v60, %v244_v47 }
 0x11d   :  { %v291_v40 = vmax.f32 %v245_v33, 0.0  ;;  %v596_v33 = vld [vmem:[%s1671_s5] sm:$0xff] }
 0x11e   :  { %v249_v50 = vpop.f32.mrb[18].mxu0 }
 0x11f   :  { %v250_v51 = vadd.f32 %v1343_v60, %v249_v50  ;;  %v251_v52 = vpop.f32.mrb[19].mxu0 }
 0x121   :  { %v292_v58 = vmax.f32 %v250_v51, 0.0 }
 0x122   :  { %v254_v61 = vpop.f32.mrb[20].mxu0 }
 0x123   :  { %v256_v62 = vpop.f32.mrb[21].mxu0  ;;  %333 = vrot.lane.b32.xlu0 %v292_v58, %s1102_s20  ;;  %v255_v41 = vadd.f32 %v1343_v60, %v254_v61  ;;  %v430_v61 = vld [vmem:[%s1670_s3 + $0x108] sm:$0xff] }
 0x124   :  { %v1012_v62 = vpack.c.bf16 %v430_v61, %v429_v59  ;;  %v700_v59 = vld [vmem:[%s1672_s7 + $0x20] sm:$0xff]  ;;  %v701_v61 = vld [vmem:[%s1672_s7 + $0x28] sm:$0xff] }
 0x125   :  { %v293_v45 = vmax.f32 %v255_v41, 0.0  ;;  %v605_v41 = vld [vmem:[%s1671_s5 + $0x48] sm:$0xff] }
 0x126   :  { %v259_v6 = vpop.f32.mrb[22].mxu0 }
 0x127   :  { %v260_v7 = vadd.f32 %v1343_v60, %v259_v6  ;;  %v261_v8 = vpop.f32.mrb[23].mxu0  ;;  %v1015_v6 = vpack.c.bf16 %v432_v4, %v431_v3  ;;  %v702_v3 = vld [vmem:[%s1672_s7 + $0x30] sm:$0xff]  ;;  %v703_v4 = vld [vmem:[%s1672_s7 + $0x38] sm:$0xff] }
 0x128   :  { %v433_v8 = vld [vmem:[%s1670_s3 + $0x120] sm:$0xff] }
 0x129   :  { %v294_v47 = vmax.f32 %v260_v7, 0.0  ;;  %v1114_v7 = vmov 0.0   ;;  %v1018_v12 = vpack.c.bf16 %v434_v9, %v433_v8  ;;  %v704_v9 = vld [vmem:[%s1672_s7 + $0x40] sm:$0xff] }
 0x12a   :  { %v264_v16 = vpop.f32.mrb[24].mxu0 }
 0x12b   :  { %v265_v17 = vadd.f32 %v1343_v60, %v264_v16  ;;  %v266_v18 = vpop.f32.mrb[25].mxu0  ;;  %v437_v16 = vld [vmem:[%s1670_s3 + $0x140] sm:$0xff] }
 0x12d   :  { %v295_v26 = vmax.f32 %v265_v17, 0.0  ;;  %v438_v17 = vld [vmem:[%s1670_s3 + $0x148] sm:$0xff] }
 0x12e   :  { %v269_v28 = vpop.f32.mrb[26].mxu0  ;;  %v1024_v18 = vpack.c.bf16 %v438_v17, %v437_v16  ;;  %v706_v16 = vld [vmem:[%s1672_s7 + $0x50] sm:$0xff]  ;;  %v707_v17 = vld [vmem:[%s1672_s7 + $0x58] sm:$0xff] }
 0x12f   :  { %v270_v29 = vadd.f32 %v1343_v60, %v269_v28  ;;  %v271_v30 = vpop.f32.mrb[27].mxu0  ;;  %326 = vrot.lane.b32.xlu0 %v295_v26, %s1103_s21  ;;  %v443_v26 = vld [vmem:[%s1670_s3 + $0x170] sm:$0xff]  ;;  %v1069_v20 = vpack.c.bf16 %v707_v17, %v706_v16 }
 0x130   :  { %v1033_v28 = vpack.c.bf16 %v444_v27, %v443_v26  ;;  %v597_v30 = vld [vmem:[%s1671_s5 + $0x8] sm:$0xff]  ;;  %v727_v26 = vld [vmem:[%s1672_s7 + $0xf8] sm:$0xff]  ;;  %v1073_v27 = vpack.c.bf16 %v709_v24, %v708_v23 }
 0x131   :  { %v296_v34 = vmax.f32 %v270_v29, 0.0 }
 0x132   :  { %v274_v22 = vpop.f32.mrb[28].mxu0 }
 0x133   :  { %339 = vrot.lane.b32.xlu1 %v296_v34, %s1104_s22  ;;  %314 = vrot.lane.b32.xlu0 %v288_v32, %s1105_s23  ;;  %v275_v35 = vadd.f32 %v1343_v60, %v274_v22  ;;  %v276_v36 = vpop.f32.mrb[29].mxu0  ;;  %v1035_v32 = vpack.c.bf16 %v599_v31, %v597_v30  ;;  %v601_v22 = vld [vmem:[%s1671_s5 + $0x28] sm:$0xff]  ;;  %v711_v30 = vld [vmem:[%s1672_s7 + $0x78] sm:$0xff] }
 0x135   :  { %v297_v46 = vmax.f32 %v275_v35, 0.0  ;;  %v603_v35 = vld [vmem:[%s1671_s5 + $0x38] sm:$0xff] }
 0x136   :  { %v279_v10 = vpop.f32.mrb[30].mxu0  ;;  %v1039_v36 = vpack.c.bf16 %v603_v35, %v601_v22 }
 0x137   :  { %357 = vrot.lane.b32.xlu1 %v286_v38, %s1106_s0  ;;  %320 = vrot.lane.b32.xlu0 %v291_v40, %s1107_s2  ;;  %v280_v42 = vadd.f32 %v1343_v60, %v279_v10  ;;  %v281_v43 = vpop.f32.mrb[31].mxu0  ;;  %v600_v38 = vld [vmem:[%s1671_s5 + $0x20] sm:$0xff]  ;;  %v607_v10 = vld [vmem:[%s1671_s5 + $0x58] sm:$0xff] }
 0x138   :  { %v1041_v40 = vpack.c.bf16 %v602_v39, %v600_v38  ;;  %v1043_v43 = vpack.c.bf16 %v607_v10, %v605_v41  ;;  %v610_v41 = vlaneseq }
 0x139   :  { %v298_v37 = vmax.f32 %v280_v42, 0.0  ;;  %v604_v42 = vld [vmem:[%s1671_s5 + $0x40] sm:$0xff] }
 0x13a   :  { %v611_v10 = vshrl.u32 %v610_v41, 7 }
 0x13b   :  { %371 = vrot.lane.b32.xlu1 %v293_v45, %s1108_s24  ;;  %365 = vrot.lane.b32.xlu0 %v290_v44, %s1109_s25  ;;  %v606_v44 = vld [vmem:[%s1671_s5 + $0x50] sm:$0xff] }
 0x13c   :  { %v1045_v45 = vpack.c.bf16 %v606_v44, %v604_v42  ;;  %v612_v42 = vsub.s32 0, %v611_v10  ;;  %v616_v44 = vsub.s32 1, %v611_v10 }
 0x13f   :  { %383 = vrot.lane.b32.xlu1 %v294_v47, %s1110_s26  ;;  %377 = vrot.lane.b32.xlu0 %v297_v46, %s1111_s27  ;;  %v712_v46 = vld [vmem:[%s1672_s7 + $0x80] sm:$0xff]  ;;  %v713_v47 = vld [vmem:[%s1672_s7 + $0x88] sm:$0xff] }
 0x143   :  { %389 = vrot.lane.b32.xlu0 %v298_v37, %s1112_s28  ;;  %v696_v37 = vld [vmem:[%s1672_s7] sm:$0xff] }
 0x175   :  { %v309_v49 = vpop.permute.xlu0 %308 }
 0x179   :  { %v346_v48 = vpop.permute.xlu1 %345 }
 0x181   :  { %v303_v60 = vpop.permute.xlu1 %302 }
 0x182   :  { %306 = vst.msk [vmem:[#allocation2] sm:$0xff] %vm305_vm2, %v303_v60  ;;  %vm1113_vm2 = vmmov 0   ;;  %v697_v60 = vld [vmem:[%s1672_s7 + $0x8] sm:$0xff] }
 0x183   :  { %312 = vst.msk [vmem:[#allocation2] sm:$0xff] %vm311_vm3, %v309_v49  ;;  %v714_v49 = vld [vmem:[%s1672_s7 + $0x90] sm:$0xff]  ;;  %vm593_vm3 = vcmask 392192  }
 0x189   :  { %v352_v51 = vpop.permute.xlu1 %351 }
 0x195   :  { %v334_v50 = vpop.permute.xlu0 %333 }
 0x1a1   :  { %v327_v52 = vpop.permute.xlu0 %326 }
 0x1a2   :  { %331 = vst.msk [vmem:[#allocation2 + $0x8] sm:$0xff] %vm89_vm0, %v327_v52  ;;  %vm386_vm0 = vcmask 851584  }
 0x1a3   :  { %337 = vst.msk [vmem:[#allocation2 + $0x8] sm:$0xff] %vm336_vm4, %v334_v50  ;;  %v715_v50 = vld [vmem:[%s1672_s7 + $0x98] sm:$0xff] }
 0x1a5   :  { %v340_v53 = vpop.permute.xlu1 %339  ;;  %v315_v54 = vpop.permute.xlu0 %314 }
 0x1a6   :  { %343 = vst.msk [vmem:[#allocation2 + $0x8] sm:$0xff] %vm342_vm5, %v340_v53  ;;  %v698_v53 = vld [vmem:[%s1672_s7 + $0x10] sm:$0xff] }
 0x1a7   :  { %318 = vst.msk [vmem:[#allocation2] sm:$0xff] %vm317_vm6, %v315_v54  ;;  %v699_v54 = vld [vmem:[%s1672_s7 + $0x18] sm:$0xff] }
 0x1a8   :  { %349 = vst.msk [vmem:[#allocation2 + $0x8] sm:$0xff] %vm348_vm7, %v346_v48  ;;  %v1047_v48 = vpack.c.bf16 %v713_v47, %v712_v46 }
 0x1a9   :  { %355 = vst.msk [vmem:[#allocation2 + $0x8] sm:$0xff] %vm354_vm8, %v352_v51  ;;  %v358_v55 = vpop.permute.xlu1 %357  ;;  %v321_v56 = vpop.permute.xlu0 %320  ;;  %v1049_v51 = vpack.c.bf16 %v697_v60, %v696_v37 }
 0x1aa   :  { %361 = vst.msk [vmem:[#allocation2 + $0x8] sm:$0xff] %vm360_vm9, %v358_v55  ;;  %1048 = vmatprep.subr.bf16.mxu0 %v1047_v48 }
 0x1ab   :  { %363 = vst.msk [vmem:[#allocation2 + $0x10] sm:$0xff] %vm362_vm10, %v358_v55  ;;  %v716_v55 = vld [vmem:[%s1672_s7 + $0xa0] sm:$0xff]  ;;  %1050 = vmatpush3.bf16.msra.mxu0 %v1049_v51 }
 0x1ac   :  { %324 = vst.msk [vmem:[#allocation2] sm:$0xff] %vm323_vm11, %v321_v56  ;;  %v717_v56 = vld [vmem:[%s1672_s7 + $0xa8] sm:$0xff] }
 0x1ad   :  { %330 = vst.msk [vmem:[#allocation2] sm:$0xff] %vm329_vm12, %v327_v52  ;;  %v372_v57 = vpop.permute.xlu1 %371  ;;  %v366_v58 = vpop.permute.xlu0 %365  ;;  %v1051_v52 = vpack.c.bf16 %v715_v50, %v714_v49 }
 0x1ae   :  { %369 = vst.msk [vmem:[#allocation2 + $0x10] sm:$0xff] %vm368_vm13, %v366_v58  ;;  %v1055_v58 = vpack.c.bf16 %v717_v56, %v716_v55 }
 0x1af   :  { %375 = vst.msk [vmem:[#allocation2 + $0x10] sm:$0xff] %vm374_vm14, %v372_v57  ;;  %v1053_v57 = vpack.c.bf16 %v699_v54, %v698_v53  ;;  %1052 = vmatprep.subr.bf16.mxu0 %v1051_v52  ;;  %v829_v52 = vld [vmem:[%s1675_s8] ss:$0 sm:$0xff] }
 0x1b1   :  { %v384_v63 = vpop.permute.xlu1 %383  ;;  %v378_v1 = vpop.permute.xlu0 %377  ;;  %v395_v2 = vld [vmem:[#allocation2 + $0x8] sm:$0xff]  ;;  %1054 = vmatpush3.bf16.msra.mxu0 %v1053_v57 }
 0x1b2   :  { %381 = vst.msk [vmem:[#allocation2 + $0x10] sm:$0xff] %vm380_vm15, %v378_v1  ;;  %516 = vmatprep.mubr.f32.mxu1 %v395_v2  ;;  %v1057_v1 = vpack.c.bf16 %v701_v61, %v700_v59  ;;  %1056 = vmatprep.subr.bf16.mxu0 %v1055_v58 }
 0x1b3   :  { %387 = vst.msk [vmem:[#allocation2 + $0x10] sm:$0xff] %vm386_vm0, %v384_v63  ;;  %v719_v63 = vld [vmem:[%s1672_s7 + $0xb8] sm:$0xff] }
 0x1b4   :  { %v394_v5 = vld [vmem:[#allocation2] sm:$0xff] }
 0x1b5   :  { %517 = vmatmul.mubr.f32.vlgmr.msra.gmra.mrb[0].mxu1 %v394_v5  ;;  %v390_v11 = vpop.permute.xlu0 %389  ;;  %v720_v5 = vld [vmem:[%s1672_s7 + $0xc0] sm:$0xff]  ;;  %1058 = vmatpush3.bf16.msra.mxu0 %v1057_v1 }
 0x1b6   :  { %1013 = vmatpush3.bf16.msra.mxu1 %v1012_v62  ;;  %949 = vmatprep.mubr.msk.f32.mxu1 %vm1113_vm2, %v1114_v7  ;;  %393 = vst.msk [vmem:[#allocation2 + $0x10] sm:$0xff] %vm392_vm1, %v390_v11  ;;  %v718_v62 = vld [vmem:[%s1672_s7 + $0xb0] sm:$0xff]  ;;  %v705_v11 = vld [vmem:[%s1672_s7 + $0x48] sm:$0xff] }
 0x1b7   :  { %1014 = vmatprep.subr.bf16.mxu1 %v1097_v0  ;;  %v1059_v2 = vpack.c.bf16 %v719_v63, %v718_v62  ;;  %v1065_v14 = vpack.c.bf16 %v705_v11, %v704_v9 }
 0x1b9   :  { %1060 = vmatprep.subr.bf16.mxu0 %v1059_v2 }
 0x1ba   :  { %1016 = vmatpush3.bf16.msra.mxu1 %v1015_v6  ;;  %v721_v6 = vld [vmem:[%s1672_s7 + $0xc8] sm:$0xff] }
 0x1bb   :  { %1017 = vmatprep.subr.bf16.mxu1 %v1097_v0  ;;  %v1063_v8 = vpack.c.bf16 %v721_v6, %v720_v5 }
 0x1bd   :  { %v396_v29 = vld [vmem:[#allocation2 + $0x10] sm:$0xff] }
 0x1be   :  { %1019 = vmatpush3.bf16.msra.mxu1 %v1018_v12  ;;  %v722_v12 = vld [vmem:[%s1672_s7 + $0xd0] sm:$0xff] }
 0x1bf   :  { %1020 = vmatprep.subr.bf16.mxu1 %v1097_v0 }
 0x1c2   :  { %1022 = vmatpush3.bf16.msra.mxu1 %v1021_v15  ;;  %v1067_v15 = vpack.c.bf16 %v723_v13, %v722_v12 }
 0x1c3   :  { %1023 = vmatprep.subr.bf16.mxu1 %v1097_v0 }
 0x1c6   :  { %1025 = vmatpush3.bf16.msra.mxu1 %v1024_v18  ;;  %v724_v18 = vld [vmem:[%s1672_s7 + $0xe0] sm:$0xff] }
 0x1c7   :  { %1026 = vmatprep.subr.bf16.mxu1 %v1097_v0 }
 0x1ca   :  { %1028 = vmatpush3.bf16.msra.mxu1 %v1027_v21  ;;  %v1071_v21 = vpack.c.bf16 %v725_v19, %v724_v18 }
 0x1cb   :  { %1029 = vmatprep.subr.bf16.mxu1 %v1097_v0 }
 0x1ce   :  { %1031 = vmatpush3.bf16.msra.mxu1 %v1030_v25  ;;  %v726_v25 = vld [vmem:[%s1672_s7 + $0xf0] sm:$0xff] }
 0x1cf   :  { %1032 = vmatprep.subr.bf16.mxu1 %v1097_v0  ;;  %v598_v0 = vld [vmem:[%s1671_s5 + $0x10] sm:$0xff] }
 0x1d0   :  { %v1037_v34 = vpack.c.bf16 %v598_v0, %v596_v33 }
 0x1d2   :  { %1034 = vmatpush3.bf16.msra.mxu1 %v1033_v28  ;;  %v1075_v28 = vpack.c.bf16 %v727_v26, %v726_v25 }
 0x1d3   :  { %1036 = vmatprep.subr.bf16.mxu1 %v1035_v32 }
 0x1d5   :  { %950 = vmatmul.mubr.f32.vlgmr.msra.gmra.mrb[2].mxu1 %v396_v29  ;;  %v710_v29 = vld [vmem:[%s1672_s7 + $0x70] sm:$0xff] }
 0x1d6   :  { %687 = vmatprep.mubr.f32.mxu1 %v1114_v7  ;;  %1038 = vmatpush1.bf16.msra.mxu1 %v1037_v34  ;;  %v1061_v7 = vpack.c.bf16 %v703_v4, %v702_v3  ;;  %v1077_v31 = vpack.c.bf16 %v711_v30, %v710_v29  ;;  %v827_v34 = vld [vmem:[%s1673_s4] ss:$0 sm:$0xff] }
 0x1d7   :  { %1040 = vmatprep.subr.bf16.mxu1 %v1039_v36 }
 0x1d8   :  { %1062 = vmatpush3.bf16.msra.mxu0 %v1061_v7 }
 0x1d9   :  { %1064 = vmatprep.subr.bf16.mxu0 %v1063_v8 }
 0x1da   :  { %1042 = vmatpush1.bf16.msra.mxu1 %v1041_v40 }
 0x1db   :  { %1044 = vmatprep.subr.bf16.mxu1 %v1043_v43  ;;  %v608_v43 = vld [vmem:[%s1674_s6] sm:$0x3] }
 0x1dc   :  { %1066 = vmatpush3.bf16.msra.mxu0 %v1065_v14  ;;  %v617_v46 = vrot.slane %v608_v43, %v616_v44 }
 0x1dd   :  { %1068 = vmatprep.subr.bf16.mxu0 %v1067_v15 }
 0x1de   :  { %1046 = vmatpush1.bf16.msra.mxu1 %v1045_v45  ;;  %v613_v45 = vrot.slane %v608_v43, %v612_v42 }
 0x1e0   :  { %1070 = vmatpush3.bf16.msra.mxu0 %v1069_v20 }
 0x1e1   :  { %1072 = vmatprep.subr.bf16.mxu0 %v1071_v21 }
 0x1e4   :  { %1074 = vmatpush3.bf16.msra.mxu0 %v1073_v27 }
 0x1e5   :  { %1076 = vmatprep.subr.bf16.mxu0 %v1075_v28 }
 0x1e8   :  { %1078 = vmatpush3.bf16.msra.mxu0 %v1077_v31 }
 0x288   :  { %v862_v32 = vpop.f32.mrb[0].mxu1 }
 0x289   :  { %v863_v33 = vpop.f32.mrb[1].mxu1 }
 0x28a   :  { %v864_v0 = vadd.f32 %v863_v33, %v862_v32 }
 0x28c   :  { %v519_v22 = vadd.f32 %v864_v0, %v827_v34 }
 0x2a8   :  { %v588_v35 = vpop.f32.mrb[2].mxu1 }
 0x2a9   :  { %v589_v36 = vadd.f32 %v588_v35, %v519_v22  ;;  %v951_v38 = vpop.f32.mrb[3].mxu1 }
 0x2ab   :  { %v592_v39 = vmax.f32 %v589_v36, 0.0 }
 0x2ad   :  { %594 = vst.msk [vmem:[#allocation3] sm:$0xff] %vm593_vm3, %v592_v39 }
 0x2b4   :  { %v595_v40 = vld [vmem:[#allocation3] sm:$0xff] }
 0x2b5   :  { %828 = vmatmul.mubr.msk.f32.vlgmr.msra.gmra.mrb[4].mxu1 %vm593_vm3, %v595_v40 }
 0x388   :  { %v689_v47 = vpop.f32.mrb[4].mxu1 }
 0x389   :  { %v690_v37 = vadd.f32 %v689_v47, %v613_v45  ;;  %v691_v48 = vpop.f32.mrb[5].mxu1 }
 0x38a   :  { %v692_v60 = vadd.f32 %v691_v48, %v617_v46 }
 0x38b   :  { %v694_v50 = vmax.f32 %v690_v37, 0.0 }
 0x38c   :  { %v695_v49 = vmax.f32 %v692_v60, 0.0 }
 0x38e   :  { %799 = vmatprep.mubr.f32.mxu0 %v695_v49 }
 0x38f   :  { %800 = vmatmul.mubr.f32.vlgmr.msra.gmra.mrb[32].mxu0 %v694_v50 }
 0x462   :  { %v914_v51 = vpop.f32.mrb[32].mxu0 }
 0x463   :  { %v915_v53 = vpop.f32.mrb[33].mxu0 }
 0x464   :  { %v916_v54 = vadd.f32 %v915_v53, %v914_v51 }
 0x466   :  { %v802_v55 = vadd.f32 %v916_v54, %v829_v52 }
 0x468   :  { %805 = vst [vmem:[%s1676_s9] sm:$0xff] %v802_v55 }

</bundles_post_ra>
